<compile_context>
chip_gen: v7x
topology: tpu7x:2x2x1
jax: 0.10.0
libtpu: 0.0.40
codegen_flags: <defaults>
</compile_context>

<pallas_src>
import functools
import math

import jax
import jax.numpy as jnp
from jax import lax
from jax.experimental import pallas as pl
from jax.experimental.pallas import tpu as pltpu


# --------------------------------------------------------------------------------------
# Single-buffering probe: grid-invariant operands don't need the default depth-2 pipeline
# (constant index_map already skips re-DMA, but 2x VMEM is still allocated). Probe once so
# the script still runs cleanly on jax builds without pipeline_mode support.
# --------------------------------------------------------------------------------------
_BUFFERED1_OK = None


def _buffered1_supported():
    global _BUFFERED1_OK
    if _BUFFERED1_OK is not None:
        return _BUFFERED1_OK
    try:
        def _probe_kernel(x_ref, o_ref):
            o_ref[...] = x_ref[...] + 1.0

        x = jnp.zeros((8, 128), jnp.float32)
        out = pl.pallas_call(
            _probe_kernel,
            out_shape=jax.ShapeDtypeStruct((8, 128), jnp.float32),
            grid=(2,),
            in_specs=[pl.BlockSpec((8, 128), lambda i: (0, 0),
                                   pipeline_mode=pl.Buffered(1))],
            out_specs=pl.BlockSpec((8, 128), lambda i: (0, 0)),
        )(x)
        out = jax.block_until_ready(out)
        _BUFFERED1_OK = bool(jnp.allclose(out, x + 1.0))
    except Exception:
        _BUFFERED1_OK = False
    return _BUFFERED1_OK


def _const_spec(block_shape):
    """BlockSpec for a grid-invariant operand (single-buffered when supported)."""
    index_map = lambda *_: (0,) * len(block_shape)
    if _buffered1_supported():
        return pl.BlockSpec(block_shape, index_map, pipeline_mode=pl.Buffered(1))
    return pl.BlockSpec(block_shape, index_map)


# ----------------------------- fc1 kernel: y = x @ W_t + b -----------------------------
def _linear_kernel(x_ref, w_ref, b_ref, o_ref):
    o_ref[...] = (
        jnp.dot(x_ref[...].astype(jnp.bfloat16), w_ref[...],
                preferred_element_type=jnp.float32)
        + b_ref[...]
    )


def linear(x2d, w_t, b):
    """x2d: (M, K) f32, w_t: (K, N) bf16 (pre-transposed), b: (N,) f32 -> (M, N) f32."""
    M, K = x2d.shape
    Nout = w_t.shape[1]
    if M >= 256 and M % 256 == 0:
        tm = 256
    elif M >= 128 and M % 128 == 0:
        tm = 128
    else:
        tm = M
    return pl.pallas_call(
        _linear_kernel,
        out_shape=jax.ShapeDtypeStruct((M, Nout), jnp.float32),
        grid=(M // tm,),
        in_specs=[
            pl.BlockSpec((tm, K), lambda i: (i, 0)),
            _const_spec((K, Nout)),
            _const_spec((1, Nout)),
        ],
        out_specs=pl.BlockSpec((tm, Nout), lambda i: (i, 0)),
        compiler_params=pltpu.CompilerParams(dimension_semantics=("parallel",)),
    )(x2d, w_t, b.reshape(1, Nout))


# ------------------- one TransformerEncoderLayer (post-norm, ReLU FFN) -----------------
def _encoder_layer_kernel(
    x_ref,
    wq_ref, wk_ref, wv_ref, wo_ref,
    vec_ref,                       # (9, E): [bq*scale, bk, bv, bo, b2, ln1w, ln1b, ln2w, ln2b]
    w1_ref, b1_ref, w2_ref,        # (nblk, E, dffb), (nblk, 1, dffb), (nblk, dffb, E)
    o_ref,
    *, num_heads,
):
    Nb, S, E = x_ref.shape
    H = num_heads
    hd = E // H
    rows = Nb * S

    vecs = vec_ref[...]
    bq, bk, bv, bo, b2 = vecs[0:1], vecs[1:2], vecs[2:3], vecs[3:4], vecs[4:5]
    ln1w, ln1b, ln2w, ln2b = vecs[5:6], vecs[6:7], vecs[7:8], vecs[8:9]

    x2d = x_ref[...].reshape(rows, E)
    xb = x2d.astype(jnp.bfloat16)

    # --- QKV projections; 1/sqrt(hd) is folded into Wq^T / bq on the host ---
    q = jnp.dot(xb, wq_ref[...], preferred_element_type=jnp.float32) + bq
    k = jnp.dot(xb, wk_ref[...], preferred_element_type=jnp.float32) + bk
    v = jnp.dot(xb, wv_ref[...], preferred_element_type=jnp.float32) + bv

    # --- batched multi-head attention: all (Nb*H) heads in one einsum stream ---
    # bf16 cast BEFORE the head relayout halves the XLU relayout bytes.
    def to_heads(t):
        return (t.astype(jnp.bfloat16)
                 .reshape(Nb, S, H, hd)
                 .transpose(0, 2, 1, 3)
                 .reshape(Nb * H, S, hd))

    qh, kh, vh = to_heads(q), to_heads(k), to_heads(v)            # (Nb*H, S, hd) bf16
    s = jnp.einsum("bqd,bkd->bqk", qh, kh, preferred_element_type=jnp.float32)
    s = s - jnp.max(s, axis=-1, keepdims=True)
    p = jnp.exp(s)
    p = p * pl.reciprocal(jnp.sum(p, axis=-1, keepdims=True), approx=False)
    ctx = jnp.einsum("bqk,bkd->bqd", p.astype(jnp.bfloat16), vh,
                     preferred_element_type=jnp.float32)           # (Nb*H, S, hd) f32
    attn = (ctx.astype(jnp.bfloat16)       # cast before the reverse relayout as well
               .reshape(Nb, H, S, hd)
               .transpose(0, 2, 1, 3)
               .reshape(rows, E))
    attn = jnp.dot(attn, wo_ref[...], preferred_element_type=jnp.float32) + bo

    # --- residual + LayerNorm 1 (post-norm), statistics in f32 ---
    h1 = x2d + attn
    mu1 = jnp.mean(h1, axis=-1, keepdims=True)
    var1 = jnp.mean((h1 - mu1) ** 2, axis=-1, keepdims=True)
    h1 = (h1 - mu1) * lax.rsqrt(var1 + 1e-5) * ln1w + ln1b

    # --- feed-forward, tiled over Dff: caps the live (rows, Dff) slab at (rows, dffb) ---
    h1b = h1.astype(jnp.bfloat16)
    nblk = w1_ref.shape[0]

    def ffn_step(j, acc):
        w1_blk = w1_ref[j]                        # (E, dffb) bf16
        b1_blk = b1_ref[j]                        # (1, dffb) f32
        ff = jnp.dot(h1b, w1_blk, preferred_element_type=jnp.float32) + b1_blk
        ff = jnp.maximum(ff, 0.0).astype(jnp.bfloat16)
        w2_blk = w2_ref[j]                        # (dffb, E) bf16
        return acc + jnp.dot(ff, w2_blk, preferred_element_type=jnp.float32)

    # b2 folded into the accumulator init.
    ff_out = lax.fori_loop(0, nblk, ffn_step, jnp.broadcast_to(b2, (rows, E)))

    # --- residual + LayerNorm 2 ---
    h2 = h1 + ff_out
    mu2 = jnp.mean(h2, axis=-1, keepdims=True)
    var2 = jnp.mean((h2 - mu2) ** 2, axis=-1, keepdims=True)
    out = (h2 - mu2) * lax.rsqrt(var2 + 1e-5) * ln2w + ln2b
    o_ref[...] = out.reshape(Nb, S, E)


def _encoder_vmem_limit(nb, S, E, Dff, dffb, H):
    """Computed per-step VMEM budget for the encoder kernel (scoped-limit override)."""
    rows = nb * S
    bf16, f32 = 2, 4
    wbuf = 1 if _buffered1_supported() else 2
    weights = (4 * E * E + 2 * E * Dff) * bf16 * wbuf
    vectors = (9 * E + Dff) * f32 * wbuf
    io_blk = 2 * 2 * rows * E * f32                      # x + out, double-buffered
    qkv = 3 * rows * E * (f32 + bf16)                    # q/k/v + bf16 head copies
    scores = 2 * nb * H * S * S * f32                    # s and p
    ctx = rows * E * (f32 + bf16)
    ln = 3 * rows * E * f32                              # h1 / h2 / out
    ffn = rows * dffb * (f32 + bf16) + rows * E * f32    # ff block + accumulator
    est = weights + vectors + io_blk + qkv + scores + ctx + ln + ffn
    est = int(est * 1.5) + (2 << 20)
    return min(max(est, 32 << 20), 96 << 20)


def encoder_layer(x_nse, p, num_heads, nb):
    N, S, E = x_nse.shape
    nblk, _, dffb = p["w1_t"].shape
    Dff = nblk * dffb
    kern = functools.partial(_encoder_layer_kernel, num_heads=num_heads)
    return pl.pallas_call(
        kern,
        out_shape=jax.ShapeDtypeStruct((N, S, E), jnp.float32),
        grid=(N // nb,),
        in_specs=[
            pl.BlockSpec((nb, S, E), lambda n: (n, 0, 0)),  # x (double-buffered)
            _const_spec((E, E)),                            # Wq^T (scale folded in)
            _const_spec((E, E)),                            # Wk^T
            _const_spec((E, E)),                            # Wv^T
            _const_spec((E, E)),                            # Wo^T
            _const_spec((9, E)),                            # packed bias / LN rows
            _const_spec((nblk, E, dffb)),                   # W1^T, Dff-blocked
            _const_spec((nblk, 1, dffb)),                   # b1,   Dff-blocked
            _const_spec((nblk, dffb, E)),                   # W2^T, Dff-blocked
        ],
        out_specs=pl.BlockSpec((nb, S, E), lambda n: (n, 0, 0)),
        compiler_params=pltpu.CompilerParams(
            dimension_semantics=("parallel",),
            vmem_limit_bytes=_encoder_vmem_limit(nb, S, E, Dff, dffb, num_heads),
        ),
    )(
        x_nse,
        p["wq_t"], p["wk_t"], p["wv_t"], p["wo_t"],
        p["vecs"],
        p["w1_t"], p["b1"], p["w2_t"],
    )


# --------------- head: blocked mean over batch dim, fc2, sigmoid ---------------
def _head_kernel(x_ref, w2_ref, b2_ref, o_ref, acc_ref, *, n_total):
    g = pl.program_id(0)

    @pl.when(g == 0)
    def _():
        acc_ref[...] = jnp.zeros_like(acc_ref)

    acc_ref[...] += jnp.sum(x_ref[...], axis=0)     # sum nbh batch elements per step

    @pl.when(g == pl.num_programs(0) - 1)
    def _():
        xm = acc_ref[...] * (1.0 / n_total)          # mean over PyTorch dim=1 (batch)
        y = jnp.dot(xm.astype(jnp.bfloat16), w2_ref[...],
                    preferred_element_type=jnp.float32) + b2_ref[...]
        o_ref[...] = jax.nn.sigmoid(y)


def head(x_nse, w2_t, b2):
    N, S, E = x_nse.shape
    nbh = max(d for d in range(1, min(N, 16) + 1) if N % d == 0)
    return pl.pallas_call(
        functools.partial(_head_kernel, n_total=N),
        out_shape=jax.ShapeDtypeStruct((S, 1), jnp.float32),
        grid=(N // nbh,),
        in_specs=[
            pl.BlockSpec((nbh, S, E), lambda n: (n, 0, 0)),
            _const_spec((E, 1)),
            _const_spec((1, 1)),
        ],
        out_specs=pl.BlockSpec((S, 1), lambda n: (0, 0)),
        scratch_shapes=[pltpu.VMEM((S, E), jnp.float32)],
        compiler_params=pltpu.CompilerParams(dimension_semantics=("arbitrary",)),
    )(x_nse, w2_t, b2.reshape(1, 1))


# --------------------------- tiling heuristics ---------------------------
def _pick_batch_group(N, S, target_rows=256, max_rows=512):
    """Divisor nb of N: rows = nb*S should fit VMEM, keep >= 2 grid steps (megacore),
    and be a multiple of 256 (v6e/v7x MXU M tile), else 128 (v5e), else 8."""
    divisors = [d for d in range(1, N + 1) if N % d == 0]

    def score(d):
        rows = d * S
        return (
            rows <= max_rows,
            (N // d) >= 2,
            rows % 256 == 0,
            rows % 128 == 0,
            rows % 8 == 0,
            -abs(rows - target_rows),
        )

    return max(divisors, key=score)


def _pick_dff_block(Dff, max_block=512):
    for blk in (512, 256, 128):
        if blk <= max_block and Dff >= blk and Dff % blk == 0:
            return blk
    return Dff


# ----------------------------------- full model -----------------------------------
def transformer_classifier(x_sni, params, num_heads, num_layers):
    S, N, I = x_sni.shape
    E = params["fc1_w_t"].shape[1]
    # Relayout BEFORE fc1: transpose the narrow I-wide input instead of the E-wide fc1
    # output; the encoder then consumes batch-major (N, S, E) with a free reshape.
    x_nsi = jnp.transpose(x_sni, (1, 0, 2))
    h = linear(x_nsi.reshape(N * S, I), params["fc1_w_t"], params["fc1_b"])   # (N*S, E)
    h = h.reshape(N, S, E)
    nb = _pick_batch_group(N, S)
    for l in range(num_layers):
        h = encoder_layer(h, params["layers"][l], num_heads, nb)
    # mean over PyTorch dim=1 (batch) + fc2 + sigmoid
    return head(h, params["fc2_w_t"], params["fc2_b"])                        # (S, 1)


# ---------------------------- deterministic parameter init -------------------------
def init_params(key, input_size, hidden, num_layers, dim_feedforward=2048):
    keys = jax.random.split(key, 2 + num_layers)

    def dense(k, out_d, in_d, scale=0.05):
        kw, kb = jax.random.split(k)
        return (
            scale * jax.random.normal(kw, (out_d, in_d), jnp.float32),
            scale * jax.random.normal(kb, (out_d,), jnp.float32),
        )

    fc1_w, fc1_b = dense(keys[0], hidden, input_size)
    fc2_w, fc2_b = dense(keys[1], 1, hidden)

    layers = []
    for l in range(num_layers):
        lk = jax.random.split(keys[2 + l], 4)
        wqkv, bqkv = dense(lk[0], 3 * hidden, hidden)
        wo, bo = dense(lk[1], hidden, hidden)
        w1, b1 = dense(lk[2], dim_feedforward, hidden)
        w2, b2 = dense(lk[3], hidden, dim_feedforward)
        layers.append(dict(
            wqkv=wqkv, bqkv=bqkv, wo=wo, bo=bo,
            ln1w=jnp.ones((hidden,), jnp.float32), ln1b=jnp.zeros((hidden,), jnp.float32),
            ln2w=jnp.ones((hidden,), jnp.float32), ln2b=jnp.zeros((hidden,), jnp.float32),
            w1=w1, b1=b1, w2=w2, b2=b2,
        ))

    return dict(fc1_w=fc1_w, fc1_b=fc1_b, fc2_w=fc2_w, fc2_b=fc2_b, layers=layers)


def prepare_params(raw, hidden, num_heads):
    """Host-side one-time prep: transpose weights to x@W form (bf16), split the fused QKV
    projection, fold 1/sqrt(head_dim) into Wq^T/bq, pack the nine E-wide bias/LN rows into
    one (9, E) array, and reshape W1^T/b1/W2^T into Dff blocks for the in-kernel FFN loop."""
    E = hidden
    hd = E // num_heads
    scale = 1.0 / math.sqrt(hd)

    def t_bf16(w):                       # (out, in) -> (in, out) bf16
        return jnp.asarray(w.T, jnp.bfloat16)

    def row(v):
        return jnp.asarray(v, jnp.float32).reshape(1, -1)

    prepped = dict(
        fc1_w_t=t_bf16(raw["fc1_w"]), fc1_b=jnp.asarray(raw["fc1_b"], jnp.float32),
        fc2_w_t=t_bf16(raw["fc2_w"]), fc2_b=jnp.asarray(raw["fc2_b"], jnp.float32),
        layers=[],
    )
    for lp in raw["layers"]:
        wqkv, bqkv = lp["wqkv"], lp["bqkv"]
        Dff = lp["w1"].shape[0]
        dffb = _pick_dff_block(Dff)
        nblk = Dff // dffb

        w1_t = t_bf16(lp["w1"])                                    # (E, Dff)
        w1_t = w1_t.reshape(E, nblk, dffb).transpose(1, 0, 2)      # (nblk, E, dffb)
        b1 = jnp.asarray(lp["b1"], jnp.float32).reshape(nblk, 1, dffb)
        w2_t = t_bf16(lp["w2"]).reshape(nblk, dffb, E)             # (nblk, dffb, E)

        vecs = jnp.concatenate([
            row(bqkv[0:E]) * scale,            # bq (q-scale folded in)
            row(bqkv[E:2 * E]),                # bk
            row(bqkv[2 * E:3 * E]),            # bv
            row(lp["bo"]),                     # bo
            row(lp["b2"]),                     # b2
            row(lp["ln1w"]), row(lp["ln1b"]),
            row(lp["ln2w"]), row(lp["ln2b"]),
        ], axis=0)                             # (9, E) f32

        prepped["layers"].append(dict(
            wq_t=(jnp.asarray(wqkv[0:E].T, jnp.float32) * scale).astype(jnp.bfloat16),
            wk_t=t_bf16(wqkv[E:2 * E]),
            wv_t=t_bf16(wqkv[2 * E:3 * E]),
            wo_t=t_bf16(lp["wo"]),
            vecs=vecs,
            w1_t=w1_t, b1=b1, w2_t=w2_t,
        ))
    return prepped


if __name__ == "__main__":
    # small shapes consistent with the module
    S, N = 8, 2                      # seq, batch (PyTorch batch_first=False layout)
    input_size, hidden = 16, 32
    num_heads, num_layers = 4, 2

    key = jax.random.PRNGKey(0)
    kx, kp = jax.random.split(key)
    x = jax.random.normal(kx, (S, N, input_size), jnp.float32)
    raw_params = init_params(kp, input_size, hidden, num_layers)
    params = prepare_params(raw_params, hidden, num_heads)

    out = transformer_classifier(x, params, num_heads, num_layers)
    out = jax.block_until_ready(out)
    assert out.shape == (S, 1)
    assert bool(jnp.all(jnp.isfinite(out)))
    print("KERNEL_OK")
</pallas_src>

<mosaic_0001>
module attributes {stable_mosaic.version = 11 : i64} {
  func.func @_probe_kernel(%arg0: i32, %arg1: memref<8x128xf32, #tpu.memory_space<vmem>>, %arg2: memref<8x128xf32, #tpu.memory_space<vmem>>) attributes {dimension_semantics = [#tpu.dimension_semantics<arbitrary>], iteration_bounds = array<i64: 2>, scalar_prefetch = 0 : i64, scratch_operands = 0 : i64, tpu.core_type = #tpu.core_type<tc>, window_params = [{pipeline_mode = #tpu.pipeline_mode<synchronous>, transform_indices = @transform_0, window_bounds = array<i64: 8, 128>}, {pipeline_mode = #tpu.pipeline_mode<synchronous>, transform_indices = @transform_1, window_bounds = array<i64: 8, 128>}]} {
    %c0 = arith.constant 0 : index
    %c0_0 = arith.constant 0 : index
    %0 = vector.load %arg1[%c0, %c0_0] : memref<8x128xf32, #tpu.memory_space<vmem>>, vector<8x128xf32>
    %cst = arith.constant 1.000000e+00 : f32
    %1 = vector.broadcast %cst : f32 to vector<8x128xf32>
    %2 = arith.addf %0, %1 : vector<8x128xf32>
    %c0_1 = arith.constant 0 : index
    %c0_2 = arith.constant 0 : index
    %3 = vector.load %arg2[%c0_1, %c0_2] : memref<8x128xf32, #tpu.memory_space<vmem>>, vector<8x128xf32>
    tpu.vector_store %arg2[%c0_1, %c0_2], %2 {strides = array<i32>} : memref<8x128xf32, #tpu.memory_space<vmem>>, vector<8x128xf32>,
    return
  }
  func.func @transform_0(%arg0: i32) -> (i32, i32) {
    %c0_i32 = arith.constant 0 : i32
    %c0_i32_0 = arith.constant 0 : i32
    %c0_i32_1 = arith.constant 0 : i32
    return %c0_i32, %c0_i32_0 : i32, i32
  }
  func.func @transform_1(%arg0: i32) -> (i32, i32) {
    %c0_i32 = arith.constant 0 : i32
    %c0_i32_0 = arith.constant 0 : i32
    %c0_i32_1 = arith.constant 0 : i32
    return %c0_i32, %c0_i32_0 : i32, i32
  }
}

module attributes {stable_mosaic.version = 11 : i64} {
  func.func @_linear_kernel(%arg0: i32, %arg1: memref<16x16xf32, #tpu.memory_space<vmem>>, %arg2: memref<16x32xbf16, #tpu.memory_space<vmem>>, %arg3: memref<1x32xf32, #tpu.memory_space<vmem>>, %arg4: memref<16x32xf32, #tpu.memory_space<vmem>>) attributes {dimension_semantics = [#tpu.dimension_semantics<parallel>], iteration_bounds = array<i64: 1>, scalar_prefetch = 0 : i64, scratch_operands = 0 : i64, tpu.core_type = #tpu.core_type<tc>, window_params = [{transform_indices = @transform_0, window_bounds = array<i64: 16, 16>}, {pipeline_mode = #tpu.pipeline_mode<synchronous>, transform_indices = @transform_1, window_bounds = array<i64: 16, 32>}, {pipeline_mode = #tpu.pipeline_mode<synchronous>, transform_indices = @transform_2, window_bounds = array<i64: 1, 32>}, {transform_indices = @transform_3, window_bounds = array<i64: 16, 32>}]} {
    %c0 = arith.constant 0 : index
    %c0_0 = arith.constant 0 : index
    %0 = vector.load %arg1[%c0, %c0_0] : memref<16x16xf32, #tpu.memory_space<vmem>>, vector<16x16xf32>
    %1 = arith.truncf %0 : vector<16x16xf32> to vector<16x16xbf16>
    %c0_1 = arith.constant 0 : index
    %c0_2 = arith.constant 0 : index
    %2 = vector.load %arg2[%c0_1, %c0_2] : memref<16x32xbf16, #tpu.memory_space<vmem>>, vector<16x32xbf16>
    %cst = arith.constant dense<0.000000e+00> : vector<16x32xf32>
    %3 = tpu.matmul %1, %2, %cst {dimension_numbers = #tpu.dot_dimension_numbers<[1], [0], [0], [1], [0, 0, 1, 1], [], []>} : vector<16x16xbf16>, vector<16x32xbf16>, vector<16x32xf32> -> vector<16x32xf32>
    %c0_3 = arith.constant 0 : index
    %c0_4 = arith.constant 0 : index
    %4 = vector.load %arg3[%c0_3, %c0_4] : memref<1x32xf32, #tpu.memory_space<vmem>>, vector<1x32xf32>
    %5 = vector.broadcast %4 : vector<1x32xf32> to vector<16x32xf32>
    %6 = arith.addf %3, %5 : vector<16x32xf32>
    %c0_5 = arith.constant 0 : index
    %c0_6 = arith.constant 0 : index
    %7 = vector.load %arg4[%c0_5, %c0_6] : memref<16x32xf32, #tpu.memory_space<vmem>>, vector<16x32xf32>
    tpu.vector_store %arg4[%c0_5, %c0_6], %6 {strides = array<i32>} : memref<16x32xf32, #tpu.memory_space<vmem>>, vector<16x32xf32>,
    return
  }
  func.func @transform_0(%arg0: i32) -> (i32, i32) {
    %c0_i32 = arith.constant 0 : i32
    %c0_i32_0 = arith.constant 0 : i32
    return %arg0, %c0_i32 : i32, i32
  }
  func.func @transform_1(%arg0: i32) -> (i32, i32) {
    %c0_i32 = arith.constant 0 : i32
    %c0_i32_0 = arith.constant 0 : i32
    %c0_i32_1 = arith.constant 0 : i32
    return %c0_i32, %c0_i32_0 : i32, i32
  }
  func.func @transform_2(%arg0: i32) -> (i32, i32) {
    %c0_i32 = arith.constant 0 : i32
    %c0_i32_0 = arith.constant 0 : i32
    %c0_i32_1 = arith.constant 0 : i32
    return %c0_i32, %c0_i32_0 : i32, i32
  }
  func.func @transform_3(%arg0: i32) -> (i32, i32) {
    %c0_i32 = arith.constant 0 : i32
    %c0_i32_0 = arith.constant 0 : i32
    return %arg0, %c0_i32 : i32, i32
  }
}

</mosaic_0001>

<bundles_post_ra>
// kernel: tpu_custom_call.1
= control target key start
LH: loop header
LB: loop body
LE: loop exit
PB: predicated region body
PF: predicated region fallthrough
CT: control target
= control target key end

     0   :  { %6 = vsyncpa [#allocation3], 0  ;;  %s341_s0 = inlined_call_operand.hbm [shape: f32[8,128], index: 0, kind: input, shape index: {}]   ;;  %s342_s1 = inlined_call_operand.hbm [shape: f32[8,128], index: 1, kind: output, shape index: {}]  }
   0x1   :  { %7 = vsyncpa [#allocation4], 0  ;;  %s262_s6 = smov 0  }
   0x2 LB: > { %s145_s7 = sadd.s32 4294967295, %s248_s6   ;;  %p146_p0 = scmp.ge.s32.totalorder %s248_s6, 1  ;;  %s248_s6 = sphi %s262_s6, %s13_s6  }
   0x3   : > { %p60_p1 = scmp.lt.s32.totalorder %s248_s6, 3  ;;  %p276_p3 = scmp.eq.s32.totalorder %s145_s7, 0 }
   0x4   : > { %s250_s10 = smov [#allocation2]   ;;  %s180_s15 = scalar_lea.hbm %s341_s0, 128 }
   0x5   : > { %p270_p2 = pnand %p146_p0, %p60_p1  ;;  %s73_s11 = sshll.u32 %s250_s10, 4  ;;  %s74_s11 = int_to_ptr.vmem [resolvable:$true] %s73_s11 }
   0x6   : > { %s347_s9 = scalar_select %p276_p3, 1, 0 }
   0x7   : > { %s346_s8 = scalar_select %p270_p2, 1, 0 }
   0x8   : > { %p162_p4 = pneg %p270_p2  ;;  %p181_p6 = scmp.ne.s32.totalorder %s341_s0, %s180_s15 }
   0x9   : > { %p187_p10 = scmp.lt.u32.totalorder %s180_s15, %s341_s0 }
   0xa   : > { %p284_p5 = pnand %p276_p3, %p162_p4 }
   0xc   : > { %p182_p7 = pneg %p284_p5 }
   0xe   : > { %p183_p8 = pnand %p182_p7, %p181_p6 }
  0x10   : > { %p184_p9 = pneg %p183_p8 }
  0x12   : > { %p189_p11 = pnand %p187_p10, %p184_p9 }
  0x14   : > { %192 = shalt.err (!%p189_p11)
}
  0x15   : > { %s193_s20 = scalar_lea.vmem %s74_s11, 128  ;;  %p201_p1 = scmp.lt.s32.totalorder %s74_s11, %s74_s11 }
  0x16   : > { %p194_p12 = scmp.ne.s32.totalorder %s74_s11, %s193_s20  ;;  %p202_p4 = scmp.lt.s32.totalorder %s193_s20, %s193_s20 }
  0x18   : > { %p196_p13 = pnand %p194_p12, %p182_p7  ;;  %p203_p3 = por %p202_p4, %p201_p1 }
  0x1a   : > { %p197_p0 = pneg %p196_p13 }
  0x1c   : > { %p204_p2 = pnand %p203_p3, %p197_p0 }
  0x1e   : > { %207 = shalt.err (!%p204_p2)
}
  0x1f   : > { %165 = dma.hbm_to_vmem [thread:$0]  (!%p284_p5), %s341_s0, 128, %s74_s11, [#allocation3]  }
  0x20   : > { %p349_p6 = scmp.ne.s32.totalorder %s346_s8, 0 }
  0x21   : > { %p350_p8 = scmp.ne.s32.totalorder (!%p349_p6), %s347_s9, 0 }
  0x22   : > { %86 = sbr.rel (%p349_p6) target bundleno = 67 (0x43), region = 24 }
  0x29   : > { %239 = dma.done.wait (%p350_p8), [#allocation3], 128  }
  0x2a   : > { %241 = vsyncadd (%p350_p8), [#allocation3], 4294967168  ;;  %s251_s23 = smov [#allocation5]   ;;  %v96_v0 = vld [vmem:[#allocation2] sm:$0xff]  ;;  %p312_p2 = scmp.eq.s32.totalorder %s145_s7, 1 }
  0x2b   : > { %s106_s24 = sshll.u32 %s251_s23, 4  ;;  %v97_v1 = vadd.f32 1.0, %v96_v0  ;;  %s107_s24 = int_to_ptr.vmem [resolvable:$true] %s106_s24 }
  0x2c   : > { %s208_s26 = scalar_lea.vmem %s107_s24, 128  ;;  %p215_p9 = scmp.lt.s32.totalorder %s107_s24, %s107_s24 }
  0x2d   : > { %98 = vst [vmem:[#allocation5] sm:$0xff] %v97_v1  ;;  %p209_p3 = scmp.ne.s32.totalorder %s107_s24, %s208_s26  ;;  %p216_p10 = scmp.lt.s32.totalorder %s208_s26, %s208_s26 }
  0x2f   : > { %p210_p5 = pnand %p209_p3, %p312_p2  ;;  %p217_p11 = por %p216_p10, %p215_p9 }
  0x31   : > { %p211_p7 = pneg %p210_p5 }
  0x33   : > { %p218_p12 = pnand %p217_p11, %p211_p7 }
  0x35   : > { %221 = shalt.err (!%p218_p12)
}
  0x36   : > { %s222_s29 = scalar_lea.hbm %s342_s1, 128 }
  0x37   : > { %p223_p13 = scmp.ne.s32.totalorder %s342_s1, %s222_s29  ;;  %p228_p4 = scmp.lt.u32.totalorder %s222_s29, %s342_s1 }
  0x39   : > { %p224_p0 = pnand %p223_p13, %p312_p2 }
  0x3b   : > { %p225_p1 = pneg %p224_p0 }
  0x3d   : > { %p230_p6 = pnand %p228_p4, %p225_p1 }
  0x3f   : > { %233 = shalt.err (!%p230_p6)
}
  0x40   : > { %159 = dma.vmem_to_hbm [thread:$0]  (%p312_p2), %s107_s24, 128, %s342_s1, [#allocation4]  }
  0x41   : > { %243 = dma.done.wait (%p312_p2), [#allocation4], 128  }
  0x42   : > { %245 = vsyncadd (%p312_p2), [#allocation4], 4294967168 }
  0x43 PF: > { %s13_s6 = sadd.s32 1, %s248_s6  }
  0x44   : > { %p10_p8 = scmp.ge.s32.totalorder %s13_s6, 4  }
  0x46   :  { %12 = sbr.rel (!%p10_p8) target bundleno = 2 (0x2), region = 53 }
  0x4d   :  { %119 = vsyncpa [#allocation3], 1 }
  0x4e   :  { %121 = vsyncpa [#allocation3 + $0x1], 1 }
  0x4f   :  { %122 = vsyncpa [#allocation4], 1 }
  0x50   :  { %124 = vsyncpa [#allocation4 + $0x1], 1 }

// kernel: tpu_custom_call.1
= control target key start
LH: loop header
LB: loop body
LE: loop exit
PB: predicated region body
PF: predicated region fallthrough
CT: control target
= control target key end

     0   :  { %8 = vsyncpa [#allocation3], 0  ;;  %s295_s0 = inlined_call_operand.hbm [shape: f32[16,16], index: 0, kind: input, shape index: {}]   ;;  %s296_s1 = inlined_call_operand.hbm [shape: bf16[16,32], index: 1, kind: input, shape index: {}]   ;;  %s297_s2 = inlined_call_operand.vmem [shape: f32[1,32], index: 2, kind: input, shape index: {}]   ;;  %s298_s3 = inlined_call_operand.hbm [shape: f32[16,32], index: 3, kind: output, shape index: {}]  }
   0x1   :  { %9 = vsyncpa [#allocation6], 0 }
   0x2   :  { %10 = vsyncpa [#allocation4], 0  ;;  %s221_s12 = smov [#allocation2]   ;;  %s149_s16 = scalar_lea.hbm %s295_s0, 256 }
   0x3   :  { %s16_s13 = sshll.u32 %s221_s12, 4  ;;  %p150_p0 = scmp.ne.s32.totalorder %s295_s0, %s149_s16  ;;  %s17_s13 = int_to_ptr.vmem [resolvable:$true] %s16_s13 }
   0x4   :  { %p153_p1 = scmp.lt.u32.totalorder %s149_s16, %s295_s0 }
   0x6   :  { %p155_p2 = pnand %p153_p1, %p150_p0 }
   0x8   :  { %158 = shalt.err (!%p155_p2)
}
   0x9   :  { %s159_s21 = scalar_lea.vmem %s17_s13, 256  ;;  %p164_p4 = scmp.lt.s32.totalorder %s17_s13, %s17_s13 }
   0xa   :  { %p160_p3 = scmp.ne.s32.totalorder %s17_s13, %s159_s21  ;;  %p165_p5 = scmp.lt.s32.totalorder %s159_s21, %s159_s21 }
   0xc   :  { %p166_p6 = por %p165_p5, %p164_p4 }
   0xe   :  { %p167_p7 = pnand %p166_p6, %p160_p3 }
  0x10   :  { %170 = shalt.err (!%p167_p7)
}
  0x11   :  { %s222_s22 = smov 128   ;;  %s223_s23 = smov 8  }
  0x12   :  { %22 = dma.hbm_to_vmem [thread:$0]  %s295_s0, 256, %s17_s13, [#allocation3], %s222_s22, %s222_s22, %s223_s23  }
  0x13   :  { %s224_s26 = smov [#allocation5]   ;;  %s171_s30 = scalar_lea.hbm %s296_s1, 128 }
  0x14   :  { %s28_s27 = sshll.u32 %s224_s26, 4  ;;  %p172_p8 = scmp.ne.s32.totalorder %s296_s1, %s171_s30  ;;  %s29_s27 = int_to_ptr.vmem [resolvable:$true] %s28_s27 }
  0x15   :  { %p175_p9 = scmp.lt.u32.totalorder %s171_s30, %s296_s1 }
  0x17   :  { %p177_p10 = pnand %p175_p9, %p172_p8 }
  0x19   :  { %180 = shalt.err (!%p177_p10)
}
  0x1a   :  { %s181_s8 = scalar_lea.vmem %s29_s27, 128  ;;  %p186_p12 = scmp.lt.s32.totalorder %s29_s27, %s29_s27 }
  0x1b   :  { %p182_p11 = scmp.ne.s32.totalorder %s29_s27, %s181_s8  ;;  %p187_p13 = scmp.lt.s32.totalorder %s181_s8, %s181_s8 }
  0x1d   :  { %p188_p0 = por %p187_p13, %p186_p12 }
  0x1f   :  { %p189_p1 = pnand %p188_p0, %p182_p11 }
  0x21   :  { %192 = shalt.err (!%p189_p1)
}
  0x22   :  { %s225_s0 = smov 64   ;;  %s226_s9 = smov 4  }
  0x23   :  { %34 = dma.hbm_to_vmem [thread:$0]  %s296_s1, 128, %s29_s27, [#allocation6], %s225_s0, %s225_s0, %s226_s9  }
  0x24   :  { %215 = dma.done.wait [#allocation3], 256  }
  0x25   :  { %216 = vsyncadd [#allocation3], 4294967040 }
  0x26   :  { %217 = dma.done.wait [#allocation6], 128  }
  0x27   :  { %218 = vsyncadd [#allocation6], 4294967168  ;;  %v227_v0 = vmov 0.0   ;;  %vm228_vm0 = vmmov 0   ;;  %v148_v1 = vld [vmem:[#allocation5] sm:$0xff]   ;;  %v44_v2 = vld [vmem:[#allocation2] sm:$0xff] }
  0x28   :  { %133 = vmatprep.subr.bf16.mxu0 %v227_v0  ;;  %135 = vmatprep.mubr.msk.bf16.mxu0 %vm228_vm0, %v227_v0  ;;  %v45_v3 = vld [vmem:[#allocation2 + $0x8] sm:$0xff]  ;;  %vm62_vm1 = vcmask 130048   ;;  %v128_v5 = vld [vmem:[%s297_s2] ss:$0 sm:$0xff]  ;;  %vm107_vm2 = vcmask 261120   ;;  %s229_s1 = smov [#allocation7]  }
  0x29   :  { %134 = vmatpush3.bf16.msra.mxu0 %v148_v1  ;;  %v46_v4 = vpack.c.bf16 %v45_v3, %v44_v2  ;;  %s115_s14 = sshll.u32 %s229_s1, 4  ;;  %s116_s14 = int_to_ptr.vmem [resolvable:$true] %s115_s14 }
  0x2a   :  { %s193_s15 = scalar_lea.vmem %s116_s14, 256  ;;  %p198_p3 = scmp.lt.s32.totalorder %s116_s14, %s116_s14 }
  0x2b   :  { %p194_p2 = scmp.ne.s32.totalorder %s116_s14, %s193_s15  ;;  %p199_p4 = scmp.lt.s32.totalorder %s193_s15, %s193_s15 }
  0x2c   :  { %136 = vmatmul.mubr.msk.bf16.vlgmr.msra.gmra.mrb[0].mxu0 %vm62_vm1, %v46_v4 }
  0x2d   :  { %p200_p5 = por %p199_p4, %p198_p3 }
  0x2f   :  { %p201_p6 = pnand %p200_p5, %p194_p2 }
  0xff   :  { %v100_v6 = vpop.f32.mrb[0].mxu0 }
 0x100   :  { %v101_v7 = vadd.f32 %v128_v5, %v100_v6  ;;  %v137_v8 = vpop.f32.mrb[1].mxu0 }
 0x101   :  { %v103_v9 = vpop.f32.mrb[2].mxu0 }
 0x102   :  { %v104_v10 = vadd.f32 %v128_v5, %v103_v9  ;;  %v138_v11 = vpop.f32.mrb[3].mxu0  ;;  %108 = vst.msk [vmem:[#allocation7] sm:$0xff] %vm107_vm2, %v101_v7 }
 0x104   :  { %109 = vst.msk [vmem:[#allocation7 + $0x8] sm:$0xff] %vm107_vm2, %v104_v10 }
 0x105   :  { %204 = shalt.err (!%p201_p6)
}
 0x106   :  { %s205_s17 = scalar_lea.hbm %s298_s3, 256 }
 0x107   :  { %p206_p7 = scmp.ne.s32.totalorder %s298_s3, %s205_s17  ;;  %p209_p8 = scmp.lt.u32.totalorder %s205_s17, %s298_s3 }
 0x109   :  { %p211_p9 = pnand %p209_p8, %p206_p7 }
 0x10b   :  { %214 = shalt.err (!%p211_p9)
}
 0x10c   :  { %121 = dma.vmem_to_hbm [thread:$0]  %s116_s14, 256, %s298_s3, [#allocation4], %s222_s22, %s222_s22, %s223_s23  }
 0x10d   :  { %219 = dma.done.wait [#allocation4], 256  }
 0x10e   :  { %220 = vsyncadd [#allocation4], 4294967040 }
 0x10f   :  { %125 = vsyncpa [#allocation3], 1 }
 0x110   :  { %126 = vsyncpa [#allocation6], 1 }
 0x111   :  { %127 = vsyncpa [#allocation4], 1 }

</bundles_post_ra>
